<compile_context>
chip_gen: v7x
topology: tpu7x:2x2x1
jax: 0.10.0
libtpu: 0.0.40
codegen_flags: <defaults>
</compile_context>

<pallas_src>
import functools

import jax
import jax.numpy as jnp
from jax.experimental import pallas as pl
from jax.experimental.pallas import tpu as pltpu


def _round_up(x, m):
    return (x + m - 1) // m * m


def _vmem_capacity_bytes():
    """Per-core VMEM capacity; conservative default (v7x per-TC) if query fails."""
    try:
        info = pltpu.get_tpu_info()
        cap = getattr(info, "vmem_capacity_bytes", None)
        if cap:
            return int(cap)
    except Exception:
        pass
    return 64 << 20


def _pick_tile_n(Np, per_col_bytes, budget, candidates=(1024, 512, 256, 128)):
    """Largest N-tile that divides Np, keeps 2 double-buffered weight slabs within
    `budget`, and — when possible — leaves >= 2 tiles so v7x's second TC gets work."""
    fitting = [c for c in candidates
               if Np % c == 0 and 2 * per_col_bytes * c <= budget]
    if not fitting:
        return 128
    multi = [c for c in fitting if Np // c >= 2]
    return (multi or fitting)[0]


# ---------------- collapsed-K kernels: single pass over the contraction -------------

def _linear1d_bias_kernel(x_ref, wt_ref, b_ref, o_ref):
    acc = jnp.dot(x_ref[...], wt_ref[...], preferred_element_type=jnp.float32)
    o_ref[...] = (acc + b_ref[...]).astype(o_ref.dtype)


def _linear1d_nobias_kernel(x_ref, wt_ref, o_ref):
    o_ref[...] = jnp.dot(x_ref[...], wt_ref[...],
                         preferred_element_type=jnp.float32).astype(o_ref.dtype)


# ---------------- 2-axis fallback kernels: K tiled, f32 VMEM accumulator ------------

def _linear2d_bias_kernel(x_ref, wt_ref, b_ref, o_ref, acc_ref):
    k = pl.program_id(1)

    @pl.when(k == 0)
    def _():
        acc_ref[...] = jnp.zeros_like(acc_ref)

    acc_ref[...] += jnp.dot(x_ref[...], wt_ref[...],
                            preferred_element_type=jnp.float32)

    @pl.when(k == pl.num_programs(1) - 1)
    def _():
        o_ref[...] = (acc_ref[...] + b_ref[...]).astype(o_ref.dtype)


def _linear2d_nobias_kernel(x_ref, wt_ref, o_ref, acc_ref):
    k = pl.program_id(1)

    @pl.when(k == 0)
    def _():
        acc_ref[...] = jnp.zeros_like(acc_ref)

    acc_ref[...] += jnp.dot(x_ref[...], wt_ref[...],
                            preferred_element_type=jnp.float32)

    @pl.when(k == pl.num_programs(1) - 1)
    def _():
        o_ref[...] = acc_ref[...].astype(o_ref.dtype)


@functools.lru_cache(maxsize=None)
def _build_linear_call(Bp, Kp, Np, tn, tk, has_bias, collapse,
                       x_dtype_name, w_dtype_name, out_dtype_name,
                       vmem_limit_bytes):
    """Build (and cache) one pallas_call variant for a bucketed shape."""
    out_dtype = jnp.dtype(out_dtype_name)
    x_bytes = jnp.dtype(x_dtype_name).itemsize
    w_bytes = jnp.dtype(w_dtype_name).itemsize
    o_bytes = out_dtype.itemsize

    flops = 2 * Bp * Kp * Np
    bytes_accessed = (Bp * Kp * x_bytes + Kp * Np * w_bytes +
                      Bp * Np * o_bytes + (Np * 4 if has_bias else 0))
    cost = pl.CostEstimate(flops=flops, transcendentals=0,
                           bytes_accessed=bytes_accessed)

    if collapse:
        # 1-D grid over N; full contraction per step; activation resident.
        grid = (Np // tn,)
        x_spec = pl.BlockSpec((Bp, Kp), lambda n: (0, 0))
        w_spec = pl.BlockSpec((Kp, tn), lambda n: (0, n))
        b_spec = pl.BlockSpec((1, tn), lambda n: (0, n))
        o_spec = pl.BlockSpec((Bp, tn), lambda n: (0, n))
        kernel = _linear1d_bias_kernel if has_bias else _linear1d_nobias_kernel
        scratch = []
        dim_sem = ("parallel",)
    else:
        # Fallback: K (reduction) innermost "arbitrary", f32 accumulator.
        grid = (Np // tn, Kp // tk)
        x_spec = pl.BlockSpec((Bp, tk), lambda n, k: (0, k))
        w_spec = pl.BlockSpec((tk, tn), lambda n, k: (k, n))
        b_spec = pl.BlockSpec((1, tn), lambda n, k: (0, n))
        o_spec = pl.BlockSpec((Bp, tn), lambda n, k: (0, n))  # resident across K
        kernel = _linear2d_bias_kernel if has_bias else _linear2d_nobias_kernel
        scratch = [pltpu.VMEM((Bp, tn), jnp.float32)]
        dim_sem = ("parallel", "arbitrary")

    in_specs = [x_spec, w_spec] + ([b_spec] if has_bias else [])

    return pl.pallas_call(
        kernel,
        out_shape=jax.ShapeDtypeStruct((Bp, Np), out_dtype),
        grid_spec=pltpu.PrefetchScalarGridSpec(
            num_scalar_prefetch=0,
            grid=grid,
            in_specs=in_specs,
            out_specs=o_spec,
            scratch_shapes=scratch),
        compiler_params=pltpu.CompilerParams(
            dimension_semantics=dim_sem,
            vmem_limit_bytes=int(vmem_limit_bytes)),
        cost_estimate=cost,
    )


class DynamicLinear:
    """JAX/Pallas port of the PyTorch DynamicLinear module."""

    _K_PAD = 512   # storage padding on the contraction axis (largest fallback tk)
    _N_PAD = 128   # storage padding on the output axis (lane multiple)

    def __init__(self, max_in_features, max_out_features, bias=True, *,
                 key=None, weight_dtype=jnp.bfloat16, vmem_budget_bytes=None):
        self.max_in_features = max_in_features
        self.max_out_features = max_out_features
        self.bias = bias
        self.active_out_features = max_out_features
        self.weight_dtype = jnp.dtype(weight_dtype)

        self._vmem_capacity = _vmem_capacity_bytes()
        # Budget for the double-buffered weight slab (<= half of VMEM by default).
        self._weight_budget = (int(vmem_budget_bytes) if vmem_budget_bytes is not None
                               else self._vmem_capacity // 4)
        self._vmem_limit = min(int(self._vmem_capacity * 0.9), 96 << 20)

        if key is None:
            key = jax.random.PRNGKey(0)
        kw, kb = jax.random.split(key)
        bound = 1.0 / (max_in_features ** 0.5)
        # Logical parameters in PyTorch nn.Linear layout (source of truth).
        self.weight = jax.random.uniform(
            kw, (max_out_features, max_in_features), jnp.float32, -bound, bound)
        self.bias_param = (
            jax.random.uniform(kb, (max_out_features,), jnp.float32, -bound, bound)
            if bias else None)
        self._refresh_padded_params()

    # ---- parameter management ------------------------------------------------------
    def load_parameters(self, weight, bias=None):
        """Update logical params AND rebuild the kernel-side padded/transposed copy,
        keeping a single source of truth (call after any weight update)."""
        self.weight = jnp.asarray(weight, jnp.float32)
        if self.bias:
            self.bias_param = jnp.asarray(bias, jnp.float32)
        self._refresh_padded_params()

    def _refresh_padded_params(self):
        self._max_in_p = _round_up(self.max_in_features, self._K_PAD)
        self._max_out_p = _round_up(self.max_out_features, self._N_PAD)
        wt = jnp.transpose(self.weight)  # [max_in, max_out]
        wt = jnp.pad(wt, ((0, self._max_in_p - self.max_in_features),
                          (0, self._max_out_p - self.max_out_features)))
        self._wt_padded = wt.astype(self.weight_dtype)     # bf16 weight stream (default)
        if self.bias:
            self._bias_padded = jnp.pad(
                self.bias_param, (0, self._max_out_p - self.max_out_features)
            ).reshape(1, self._max_out_p).astype(jnp.float32)
        else:
            self._bias_padded = None

    def get_active_weight(self, out_features, in_features):
        return self.weight[:out_features, :in_features]

    def get_active_bias(self, out_features):
        return self.bias_param[:out_features] if self.bias else None

    # ---- forward -------------------------------------------------------------------
    def __call__(self, x, out_features=None):
        if out_features is None:
            out_features = self.active_out_features
        B, K = x.shape
        N = int(out_features)
        assert K <= self.max_in_features, (
            f"x has {K} in_features > max_in_features={self.max_in_features}")
        assert 0 < N <= self.max_out_features

        w_bytes = self.weight_dtype.itemsize
        # Compute dtype for the activation: match the bf16 weight stream (MXU bf16),
        # otherwise keep x's own dtype.
        if self.weight_dtype == jnp.dtype(jnp.bfloat16):
            x_cdtype = jnp.dtype(jnp.bfloat16)
        else:
            x_cdtype = jnp.dtype(x.dtype)
        sublane = 16 if x_cdtype.itemsize == 2 else 8
        Bp = _round_up(B, sublane)

        # Bucket active widths -> lane-dense tiles + bounded number of compiles.
        Kp = min(_round_up(K, 128), self._max_in_p)
        Np = min(_round_up(N, 128), self._max_out_p)

        budget = self._weight_budget
        # Collapse the contraction axis whenever even the narrowest full-(Kp, 128)
        # weight slab, double-buffered, fits the per-generation VMEM budget.
        collapse = 2 * Kp * 128 * w_bytes <= budget
        if collapse:
            tk = Kp
            tn = _pick_tile_n(Np, Kp * w_bytes, budget,
                              candidates=(1024, 512, 256, 128))
        else:
            # Very large contraction: coarse K bucket so tk >= 512 is available.
            Kp = min(_round_up(K, self._K_PAD), self._max_in_p)
            tk = next(c for c in (2048, 1024, 512, 256, 128) if Kp % c == 0)
            tn = _pick_tile_n(Np, tk * w_bytes, budget,
                              candidates=(512, 256, 128))

        # Zero-pad the activation (batch rows + contraction columns). Extra weight
        # rows are either real values (killed by zero x columns) or stored zeros, so
        # the result is exact; extra output rows/cols are sliced off below.
        x_in = x.astype(x_cdtype)
        if (Bp, Kp) != (B, K):
            x_in = jnp.pad(x_in, ((0, Bp - B), (0, Kp - K)))

        out_dtype = jnp.dtype(x.dtype)
        call = _build_linear_call(
            Bp, Kp, Np, tn, tk, self.bias, collapse,
            x_cdtype.name, self.weight_dtype.name, out_dtype.name,
            self._vmem_limit)

        if self.bias:
            y_full = call(x_in, self._wt_padded, self._bias_padded)
        else:
            y_full = call(x_in, self._wt_padded)
        return y_full[:B, :N]


if __name__ == "__main__":
    key = jax.random.PRNGKey(0)
    k_mod, k_mod2, k_mod3, k_x, k_x2, k_x3 = jax.random.split(key, 6)

    # --- Case 1: small shapes, exact f32 weight path (collapsed-K kernel) ----------
    module = DynamicLinear(32, 24, bias=True, key=k_mod, weight_dtype=jnp.float32)
    x = jax.random.normal(k_x, (8, 32), jnp.float32)
    active_out = 16
    y = jax.block_until_ready(module(x, out_features=active_out))
    w_ref = module.get_active_weight(active_out, 32)
    b_ref = module.get_active_bias(active_out)
    y_ref = jnp.matmul(x, w_ref.T, precision=jax.lax.Precision.HIGHEST) + b_ref
    assert y.shape == (8, active_out)
    assert jnp.allclose(y, y_ref, atol=1e-4, rtol=1e-4)

    # --- Case 2: bf16 weight stream, collapsed-K, K/N bucketing + output slicing ----
    module2 = DynamicLinear(512, 384, bias=False, key=k_mod2)   # bf16 default
    x2 = jax.random.normal(k_x2, (8, 320), jnp.float32)
    active_out2 = 300
    y2 = jax.block_until_ready(module2(x2, out_features=active_out2))
    w_q2 = module2.get_active_weight(active_out2, 320).astype(jnp.bfloat16).astype(jnp.float32)
    x_q2 = x2.astype(jnp.bfloat16).astype(jnp.float32)
    y_ref2 = jnp.matmul(x_q2, w_q2.T, precision=jax.lax.Precision.HIGHEST)
    assert y2.shape == (8, active_out2)
    assert jnp.allclose(y2, y_ref2, atol=2e-3, rtol=2e-3)

    # --- Case 3: force the 2-axis fallback path (tiny VMEM budget), with bias -------
    module3 = DynamicLinear(1280, 256, bias=True, key=k_mod3,
                            vmem_budget_bytes=256 * 1024)
    x3 = jax.random.normal(k_x3, (8, 1280), jnp.float32)
    active_out3 = 200
    y3 = jax.block_until_ready(module3(x3, out_features=active_out3))
    w_q3 = module3.get_active_weight(active_out3, 1280).astype(jnp.bfloat16).astype(jnp.float32)
    b_ref3 = module3.get_active_bias(active_out3)
    x_q3 = x3.astype(jnp.bfloat16).astype(jnp.float32)
    y_ref3 = jnp.matmul(x_q3, w_q3.T, precision=jax.lax.Precision.HIGHEST) + b_ref3
    assert y3.shape == (8, active_out3)
    assert jnp.allclose(y3, y_ref3, atol=2e-3, rtol=2e-3)

    print("KERNEL_OK")
</pallas_src>

<mosaic_0001>
module attributes {stable_mosaic.version = 11 : i64} {
  func.func @_linear1d_bias_kernel(%arg0: i32, %arg1: memref<8x128xf32, #tpu.memory_space<vmem>>, %arg2: memref<128x128xf32, #tpu.memory_space<vmem>>, %arg3: memref<1x128xf32, #tpu.memory_space<vmem>>, %arg4: memref<8x128xf32, #tpu.memory_space<vmem>>) attributes {dimension_semantics = [#tpu.dimension_semantics<parallel>], iteration_bounds = array<i64: 1>, scalar_prefetch = 0 : i64, scratch_operands = 0 : i64, tpu.core_type = #tpu.core_type<tc>, window_params = [{pipeline_mode = #tpu.pipeline_mode<synchronous>, transform_indices = @transform_0, window_bounds = array<i64: 8, 128>}, {transform_indices = @transform_1, window_bounds = array<i64: 128, 128>}, {transform_indices = @transform_2, window_bounds = array<i64: 1, 128>}, {transform_indices = @transform_3, window_bounds = array<i64: 8, 128>}]} {
    %c0 = arith.constant 0 : index
    %c0_0 = arith.constant 0 : index
    %0 = vector.load %arg1[%c0, %c0_0] : memref<8x128xf32, #tpu.memory_space<vmem>>, vector<8x128xf32>
    %c0_1 = arith.constant 0 : index
    %c0_2 = arith.constant 0 : index
    %1 = vector.load %arg2[%c0_1, %c0_2] : memref<128x128xf32, #tpu.memory_space<vmem>>, vector<128x128xf32>
    %cst = arith.constant dense<0.000000e+00> : vector<8x128xf32>
    %2 = tpu.matmul %0, %1, %cst {dimension_numbers = #tpu.dot_dimension_numbers<[1], [0], [0], [1], [0, 0, 1, 1], [], []>} : vector<8x128xf32>, vector<128x128xf32>, vector<8x128xf32> -> vector<8x128xf32>
    %c0_3 = arith.constant 0 : index
    %c0_4 = arith.constant 0 : index
    %3 = vector.load %arg3[%c0_3, %c0_4] : memref<1x128xf32, #tpu.memory_space<vmem>>, vector<1x128xf32>
    %4 = vector.broadcast %3 : vector<1x128xf32> to vector<8x128xf32>
    %5 = arith.addf %2, %4 : vector<8x128xf32>
    %c0_5 = arith.constant 0 : index
    %c0_6 = arith.constant 0 : index
    %6 = vector.load %arg4[%c0_5, %c0_6] : memref<8x128xf32, #tpu.memory_space<vmem>>, vector<8x128xf32>
    tpu.vector_store %arg4[%c0_5, %c0_6], %5 {strides = array<i32>} : memref<8x128xf32, #tpu.memory_space<vmem>>, vector<8x128xf32>,
    return
  }
  func.func @transform_0(%arg0: i32) -> (i32, i32) {
    %c0_i32 = arith.constant 0 : i32
    %c0_i32_0 = arith.constant 0 : i32
    %c0_i32_1 = arith.constant 0 : i32
    return %c0_i32, %c0_i32_0 : i32, i32
  }
  func.func @transform_1(%arg0: i32) -> (i32, i32) {
    %c0_i32 = arith.constant 0 : i32
    %c0_i32_0 = arith.constant 0 : i32
    return %c0_i32, %arg0 : i32, i32
  }
  func.func @transform_2(%arg0: i32) -> (i32, i32) {
    %c0_i32 = arith.constant 0 : i32
    %c0_i32_0 = arith.constant 0 : i32
    return %c0_i32, %arg0 : i32, i32
  }
  func.func @transform_3(%arg0: i32) -> (i32, i32) {
    %c0_i32 = arith.constant 0 : i32
    %c0_i32_0 = arith.constant 0 : i32
    return %c0_i32, %arg0 : i32, i32
  }
}

</mosaic_0001>

<bundles_post_ra>
// kernel: tpu_custom_call.1
= control target key start
LH: loop header
LB: loop body
LE: loop exit
PB: predicated region body
PF: predicated region fallthrough
CT: control target
= control target key end

     0   :  { %8 = vsyncpa [#allocation3], 0  ;;  %s386_s0 = inlined_call_operand.hbm [shape: f32[8,128], index: 0, kind: input, shape index: {}]   ;;  %s387_s1 = inlined_call_operand.hbm [shape: f32[512,128], index: 1, kind: input, shape index: {}]   ;;  %s388_s2 = inlined_call_operand.vmem [shape: f32[1,128], index: 2, kind: input, shape index: {}]   ;;  %s389_s3 = inlined_call_operand.hbm [shape: f32[8,128], index: 3, kind: output, shape index: {}]  }
   0x1   :  { %9 = vsyncpa [#allocation6], 0 }
   0x2   :  { %10 = vsyncpa [#allocation4], 0  ;;  %s309_s12 = smov [#allocation2]   ;;  %s310_s14 = smov [#allocation5]  }
   0x3   :  { %s17_s13 = sshll.u32 %s309_s12, 4  ;;  %s26_s15 = sshll.u32 %s310_s14, 4  ;;  %s18_s13 = int_to_ptr.vmem [resolvable:$true] %s17_s13  ;;  %s337_s15 = int_to_ptr.vmem [resolvable:$true] %s26_s15 }
   0x4   :  { %s237_s18 = scalar_lea.hbm %s386_s0, 128 }
   0x5   :  { %p238_p0 = scmp.ne.s32.totalorder %s386_s0, %s237_s18  ;;  %p241_p1 = scmp.lt.u32.totalorder %s237_s18, %s386_s0 }
   0x7   :  { %p243_p2 = pnand %p241_p1, %p238_p0 }
   0x9   :  { %246 = shalt.err (!%p243_p2)
}
   0xa   :  { %s247_s23 = scalar_lea.vmem %s18_s13, 128  ;;  %p252_p4 = scmp.lt.s32.totalorder %s18_s13, %s18_s13 }
   0xb   :  { %p248_p3 = scmp.ne.s32.totalorder %s18_s13, %s247_s23  ;;  %p253_p5 = scmp.lt.s32.totalorder %s247_s23, %s247_s23 }
   0xd   :  { %p254_p6 = por %p253_p5, %p252_p4 }
   0xf   :  { %p255_p7 = pnand %p254_p6, %p248_p3 }
  0x11   :  { %258 = shalt.err (!%p255_p7)
}
  0x12   :  { %20 = dma.hbm_to_vmem [thread:$0]  %s386_s0, 128, %s18_s13, [#allocation3]  }
  0x13   :  { %s259_s28 = scalar_lea.hbm %s387_s1, 2048  ;;  %s261_s6 = scalar_lea.hbm %s387_s1, 8192 }
  0x14   :  { %p260_p8 = scmp.ne.s32.totalorder %s387_s1, %s259_s28  ;;  %p262_p9 = scmp.lt.u32.totalorder %s261_s6, %s259_s28 }
  0x15   :  { %p263_p10 = scmp.lt.u32.totalorder %s259_s28, %s387_s1 }
  0x17   :  { %p264_p11 = por %p263_p10, %p262_p9 }
  0x19   :  { %p265_p12 = pnand %p264_p11, %p260_p8 }
  0x1b   :  { %268 = shalt.err (!%p265_p12)
}
  0x1c   :  { %s269_s0 = scalar_lea.vmem %s337_s15, 2048  ;;  %p274_p0 = scmp.lt.s32.totalorder %s337_s15, %s337_s15 }
  0x1d   :  { %p270_p13 = scmp.ne.s32.totalorder %s337_s15, %s269_s0  ;;  %p275_p1 = scmp.lt.s32.totalorder %s269_s0, %s269_s0 }
  0x1f   :  { %p276_p2 = por %p275_p1, %p274_p0 }
  0x21   :  { %p277_p3 = pnand %p276_p2, %p270_p13 }
  0x23   :  { %280 = shalt.err (!%p277_p3)
}
  0x24   :  { %s311_s9 = smov 128   ;;  %s312_s10 = smov 8  }
  0x25   :  { %32 = dma.hbm_to_vmem [thread:$0]  %s387_s1, 2048, %s337_s15, [#allocation6], %s311_s9, %s311_s9, %s312_s10  }
  0x26   :  { %303 = dma.done.wait [#allocation3], 128  }
  0x27   :  { %304 = vsyncadd [#allocation3], 4294967168 }
  0x28   :  { %305 = dma.done.wait [#allocation6], 2048  }
  0x29   :  { %306 = vsyncadd [#allocation6], 4294965248  ;;  %v313_v0 = vmov 0.0|0.0   ;;  %vm314_vm0 = vmmov 0   ;;  %v315_v1 = vmov 0.0   ;;  %v42_v2 = vld [vmem:[#allocation5] sm:$0xff] }
  0x2a   :  { %205 = vmatprep.subr.bf16.mxu0 %v313_v0  ;;  %202 = vmatprep.mubr.msk.f32.mxu0 %vm314_vm0, %v315_v1  ;;  %v43_v3 = vld [vmem:[#allocation5 + $0x8] sm:$0xff]  ;;  %v44_v4 = vld [vmem:[#allocation5 + $0x10] sm:$0xff]  ;;  %v45_v6 = vld [vmem:[#allocation5 + $0x18] sm:$0xff]  ;;  %s316_s14 = smov [#allocation7]  }
  0x2b   :  { %v206_v5 = vpack.c.bf16 %v43_v3, %v42_v2  ;;  %v209_v7 = vpack.c.bf16 %v45_v6, %v44_v4  ;;  %v46_v8 = vld [vmem:[#allocation5 + $0x20] sm:$0xff]  ;;  %v47_v9 = vld [vmem:[#allocation5 + $0x28] sm:$0xff]  ;;  %v48_v11 = vld [vmem:[#allocation5 + $0x30] sm:$0xff]  ;;  %s142_s15 = sshll.u32 %s316_s14, 4  ;;  %s143_s15 = int_to_ptr.vmem [resolvable:$true] %s142_s15 }
  0x2c   :  { %v212_v10 = vpack.c.bf16 %v47_v9, %v46_v8  ;;  %v49_v12 = vld [vmem:[#allocation5 + $0x38] sm:$0xff]  ;;  %v50_v14 = vld [vmem:[#allocation5 + $0x40] sm:$0xff]  ;;  %v51_v15 = vld [vmem:[#allocation5 + $0x48] sm:$0xff]  ;;  %s281_s16 = scalar_lea.vmem %s143_s15, 128  ;;  %p286_p5 = scmp.lt.s32.totalorder %s143_s15, %s143_s15 }
  0x2d   :  { %207 = vmatpush3.bf16.msra.mxu0 %v206_v5  ;;  %v215_v13 = vpack.c.bf16 %v49_v12, %v48_v11  ;;  %v218_v16 = vpack.c.bf16 %v51_v15, %v50_v14  ;;  %v52_v17 = vld [vmem:[#allocation5 + $0x50] sm:$0xff]  ;;  %v53_v18 = vld [vmem:[#allocation5 + $0x58] sm:$0xff]  ;;  %v54_v20 = vld [vmem:[#allocation5 + $0x60] sm:$0xff]  ;;  %p282_p4 = scmp.ne.s32.totalorder %s143_s15, %s281_s16  ;;  %p287_p6 = scmp.lt.s32.totalorder %s281_s16, %s281_s16 }
  0x2e   :  { %208 = vmatprep.subr.bf16.mxu0 %v313_v0  ;;  %v221_v19 = vpack.c.bf16 %v53_v18, %v52_v17  ;;  %v55_v21 = vld [vmem:[#allocation5 + $0x68] sm:$0xff]  ;;  %v56_v23 = vld [vmem:[#allocation5 + $0x70] sm:$0xff]  ;;  %v57_v24 = vld [vmem:[#allocation5 + $0x78] sm:$0xff] }
  0x2f   :  { %v224_v22 = vpack.c.bf16 %v55_v21, %v54_v20  ;;  %v227_v25 = vpack.c.bf16 %v57_v24, %v56_v23  ;;  %v41_v26 = vld [vmem:[#allocation2] sm:$0xff]  ;;  %p288_p7 = por %p287_p6, %p286_p5 }
  0x30   :  { %v152_v27 = vld [vmem:[%s388_s2] ss:$0 sm:$0xff] }
  0x31   :  { %210 = vmatpush3.bf16.msra.mxu0 %v209_v7  ;;  %p289_p8 = pnand %p288_p7, %p282_p4 }
  0x32   :  { %211 = vmatprep.subr.bf16.mxu0 %v313_v0 }
  0x35   :  { %213 = vmatpush3.bf16.msra.mxu0 %v212_v10 }
  0x36   :  { %214 = vmatprep.subr.bf16.mxu0 %v313_v0 }
  0x39   :  { %216 = vmatpush3.bf16.msra.mxu0 %v215_v13 }
  0x3a   :  { %217 = vmatprep.subr.bf16.mxu0 %v313_v0 }
  0x3d   :  { %219 = vmatpush3.bf16.msra.mxu0 %v218_v16 }
  0x3e   :  { %220 = vmatprep.subr.bf16.mxu0 %v313_v0 }
  0x41   :  { %222 = vmatpush3.bf16.msra.mxu0 %v221_v19 }
  0x42   :  { %223 = vmatprep.subr.bf16.mxu0 %v313_v0 }
  0x45   :  { %225 = vmatpush3.bf16.msra.mxu0 %v224_v22 }
  0x46   :  { %226 = vmatprep.subr.bf16.mxu0 %v313_v0 }
  0x49   :  { %228 = vmatpush3.bf16.msra.mxu0 %v227_v25 }
  0x4c   :  { %203 = vmatmul.mubr.f32.vlgmr.msra.gmra.mrb[0].mxu0 %v41_v26 }
 0x11f   :  { %v131_v28 = vpop.f32.mrb[0].mxu0 }
 0x120   :  { %v132_v29 = vadd.f32 %v152_v27, %v131_v28  ;;  %v204_v30 = vpop.f32.mrb[1].mxu0 }
 0x122   :  { %135 = vst [vmem:[#allocation7] sm:$0xff] %v132_v29 }
 0x123   :  { %292 = shalt.err (!%p289_p8)
}
 0x124   :  { %s293_s19 = scalar_lea.hbm %s389_s3, 128 }
 0x125   :  { %p294_p9 = scmp.ne.s32.totalorder %s389_s3, %s293_s19  ;;  %p297_p10 = scmp.lt.u32.totalorder %s293_s19, %s389_s3 }
 0x127   :  { %p299_p11 = pnand %p297_p10, %p294_p9 }
 0x129   :  { %302 = shalt.err (!%p299_p11)
}
 0x12a   :  { %145 = dma.vmem_to_hbm [thread:$0]  %s143_s15, 128, %s389_s3, [#allocation4]  }
 0x12b   :  { %307 = dma.done.wait [#allocation4], 128  }
 0x12c   :  { %308 = vsyncadd [#allocation4], 4294967168 }
 0x12d   :  { %149 = vsyncpa [#allocation3], 1 }
 0x12e   :  { %150 = vsyncpa [#allocation6], 1 }
 0x12f   :  { %151 = vsyncpa [#allocation4], 1 }

</bundles_post_ra>
